<compile_context>
chip_gen: v7x
topology: tpu7x:2x2x1
jax: 0.10.0
libtpu: 0.0.40
codegen_flags: <defaults>
</compile_context>

<pallas_src>
import jax
import jax.numpy as jnp
from jax.experimental import pallas as pl
from jax.experimental.pallas import tpu as pltpu


def _triplet_net_kernel(x_ref, w0_ref, w1_ref, w2_ref, bias_ref, o_ref):
    """Fused extractor + ranker MLP over one row tile.

    x_ref:    (TR, Din) f32   flattened images (cast to bf16 in-kernel)
    w0_ref:   (Din, F)  bf16  synthetic raw-feature-extractor Linear
    w1_ref:   (F, Hh)   bf16  ranker hidden Linear
    w2_ref:   (Hh, E)   bf16  ranker output Linear -> embedding
    bias_ref: (3, BP)   f32   packed biases: row0[:F]=b0, row1[:Hh]=b1, row2[:E]=b2
    o_ref:    (TR, E)   f32
    """
    F = w0_ref.shape[1]
    Hh = w1_ref.shape[1]
    E = w2_ref.shape[1]

    # In-kernel fp32 -> bf16 narrow (free VPU filler under MXU/DMA path).
    x = x_ref[...].astype(w0_ref.dtype)
    b = bias_ref[...]

    # raw feature extractor: flatten -> Linear -> ReLU  (bf16 MXU, f32 acc)
    f = jnp.dot(x, w0_ref[...], preferred_element_type=jnp.float32) + b[0:1, :F]
    f = jnp.maximum(f, 0.0)
    # ranker: Linear -> ReLU -> Dropout(identity, eval) -> Linear
    h = jnp.dot(f.astype(w1_ref.dtype), w1_ref[...],
                preferred_element_type=jnp.float32) + b[1:2, :Hh]
    h = jnp.maximum(h, 0.0)
    e = jnp.dot(h.astype(w2_ref.dtype), w2_ref[...],
                preferred_element_type=jnp.float32) + b[2:3, :E]
    o_ref[...] = e.astype(o_ref.dtype)


def prepare_params(params, matmul_dtype=jnp.bfloat16):
    """One-time prep: pre-cast weights to bf16 and pack biases into one array."""
    w0, b0, w1, b1, w2, b2 = params
    F, Hh, E = w0.shape[1], w1.shape[1], w2.shape[1]
    BP = ((max(F, Hh, E) + 127) // 128) * 128  # lane-pad packed biases
    bias = jnp.zeros((3, BP), jnp.float32)
    bias = bias.at[0, :F].set(b0.reshape(-1))
    bias = bias.at[1, :Hh].set(b1.reshape(-1))
    bias = bias.at[2, :E].set(b2.reshape(-1))
    return (w0.astype(matmul_dtype),
            w1.astype(matmul_dtype),
            w2.astype(matmul_dtype),
            bias)


def time_course_triplet_net_forward(x, prepared, *, Nt, embedding_size,
                                    row_tile=256):
    """Returns (t_stack [B, Nt, E], time_course_embedding [B, Nt*E])."""
    B, Nt_in, C, H, W = x.shape
    assert Nt_in == Nt
    Din = C * H * W
    R = B * Nt

    # Layout contract: x must be contiguous row-major (B, Nt, C, H, W) so this
    # reshape is free (row r = b*Nt + t holds x[b, t] flattened).
    x_rows = x.reshape(R, Din)  # stays fp32; narrowed in-kernel

    w0, w1, w2, bias = prepared
    F, Hh, E = w0.shape[1], w1.shape[1], w2.shape[1]
    assert E == embedding_size

    # Row tile: single step at small R; multiple-of-8 tile (sized for v7x's
    # 64 MiB VMEM) sharded across TensorCores when R grows.
    TR = R if R <= row_tile else row_tile
    grid = (pl.cdiv(R, TR),)

    flops = 2 * R * (Din * F + F * Hh + Hh * E)
    bytes_accessed = (x_rows.size * 4 + w0.size * 2 + w1.size * 2
                      + w2.size * 2 + bias.size * 4 + R * E * 4)

    out = pl.pallas_call(
        _triplet_net_kernel,
        out_shape=jax.ShapeDtypeStruct((R, E), jnp.float32),
        grid_spec=pltpu.PrefetchScalarGridSpec(
            num_scalar_prefetch=0,
            grid=grid,
            in_specs=[
                pl.BlockSpec((TR, Din), lambda i: (i, 0)),   # rows: gridded
                pl.BlockSpec(w0.shape, lambda i: (0, 0)),    # weights: one DMA
                pl.BlockSpec(w1.shape, lambda i: (0, 0)),
                pl.BlockSpec(w2.shape, lambda i: (0, 0)),
                pl.BlockSpec(bias.shape, lambda i: (0, 0)),  # packed biases
            ],
            out_specs=pl.BlockSpec((TR, E), lambda i: (i, 0)),
        ),
        compiler_params=pltpu.CompilerParams(
            dimension_semantics=("parallel",)),
        cost_estimate=pl.CostEstimate(
            flops=flops, transcendentals=0, bytes_accessed=bytes_accessed),
    )(x_rows, w0, w1, w2, bias)

    # Zero-cost row-major reshapes (no transposes):
    t_stack = out.reshape(B, Nt, E)                 # torch.stack(..., dim=1)
    time_course_embedding = out.reshape(B, Nt * E)  # .view(-1, Nt * E)
    return t_stack, time_course_embedding


def init_params(key, Din, feature_size, ranker_hidden, embedding_size):
    """Deterministic parameter init (Linear weights stored as (in, out), f32)."""
    k0, k1, k2 = jax.random.split(key, 3)
    s0 = 1.0 / jnp.sqrt(Din)
    s1 = 1.0 / jnp.sqrt(feature_size)
    s2 = 1.0 / jnp.sqrt(ranker_hidden)
    w0 = jax.random.uniform(k0, (Din, feature_size), jnp.float32, -s0, s0)
    b0 = jnp.zeros((1, feature_size), jnp.float32)
    w1 = jax.random.uniform(k1, (feature_size, ranker_hidden), jnp.float32, -s1, s1)
    b1 = jnp.zeros((1, ranker_hidden), jnp.float32)
    w2 = jax.random.uniform(k2, (ranker_hidden, embedding_size), jnp.float32, -s2, s2)
    b2 = jnp.zeros((1, embedding_size), jnp.float32)
    return (w0, b0, w1, b1, w2, b2)


def _reference_forward(x, params, *, Nt, embedding_size):
    """Pure-JAX fp32 reference of the same forward (for a tolerance check)."""
    B = x.shape[0]
    Din = x.shape[2] * x.shape[3] * x.shape[4]
    w0, b0, w1, b1, w2, b2 = params
    x_rows = x.reshape(B * Nt, Din)
    f = jnp.maximum(x_rows @ w0 + b0, 0.0)
    h = jnp.maximum(f @ w1 + b1, 0.0)
    e = h @ w2 + b2
    return e.reshape(B, Nt, embedding_size), e.reshape(B, Nt * embedding_size)


if __name__ == "__main__":
    # architecture = {'Nt': 8, 'ranker': [32], 'embedding_size': 32,
    #                 'dropout': 0.25, 'raw_feature_extractor': <synthetic>}
    B, Nt, C, H, W = 2, 8, 4, 16, 16
    feature_size = 64       # raw_feature_extractor.feature_size
    ranker_hidden = 32      # architecture['ranker'] = [32]
    embedding_size = 32     # architecture['embedding_size']

    key = jax.random.PRNGKey(0)
    kx, kp = jax.random.split(key)
    x = jax.random.normal(kx, (B, Nt, C, H, W), dtype=jnp.float32)
    params = init_params(kp, C * H * W, feature_size, ranker_hidden,
                         embedding_size)
    prepared = prepare_params(params)   # one-time bf16 cast + bias packing

    fwd = jax.jit(
        lambda x, p: time_course_triplet_net_forward(
            x, p, Nt=Nt, embedding_size=embedding_size))
    t_stack, time_course_embedding = fwd(x, prepared)
    jax.block_until_ready((t_stack, time_course_embedding))

    assert t_stack.shape == (B, Nt, embedding_size)
    assert time_course_embedding.shape == (B, Nt * embedding_size)
    # the flattened embedding must be the per-time-point stack laid out along Nt
    assert bool(
        jnp.allclose(time_course_embedding.reshape(B, Nt, embedding_size),
                     t_stack))
    # loose-tolerance check vs fp32 pure-JAX reference (bf16 matmul operands)
    ref_stack, ref_emb = _reference_forward(
        x, params, Nt=Nt, embedding_size=embedding_size)
    assert bool(jnp.allclose(t_stack, ref_stack, rtol=5e-2, atol=5e-2))
    assert bool(jnp.allclose(time_course_embedding, ref_emb, rtol=5e-2, atol=5e-2))
    print("KERNEL_OK")
</pallas_src>

<mosaic_0001>
module attributes {stable_mosaic.version = 11 : i64} {
  func.func @_triplet_net_kernel(%arg0: i32, %arg1: memref<16x1024xf32, #tpu.memory_space<vmem>>, %arg2: memref<1024x64xbf16, #tpu.memory_space<vmem>>, %arg3: memref<64x32xbf16, #tpu.memory_space<vmem>>, %arg4: memref<32x32xbf16, #tpu.memory_space<vmem>>, %arg5: memref<3x128xf32, #tpu.memory_space<vmem>>, %arg6: memref<16x32xf32, #tpu.memory_space<vmem>>) attributes {dimension_semantics = [#tpu.dimension_semantics<parallel>], iteration_bounds = array<i64: 1>, scalar_prefetch = 0 : i64, scratch_operands = 0 : i64, tpu.core_type = #tpu.core_type<tc>, window_params = [{transform_indices = @transform_0, window_bounds = array<i64: 16, 1024>}, {pipeline_mode = #tpu.pipeline_mode<synchronous>, transform_indices = @transform_1, window_bounds = array<i64: 1024, 64>}, {pipeline_mode = #tpu.pipeline_mode<synchronous>, transform_indices = @transform_2, window_bounds = array<i64: 64, 32>}, {pipeline_mode = #tpu.pipeline_mode<synchronous>, transform_indices = @transform_3, window_bounds = array<i64: 32, 32>}, {pipeline_mode = #tpu.pipeline_mode<synchronous>, transform_indices = @transform_4, window_bounds = array<i64: 3, 128>}, {transform_indices = @transform_5, window_bounds = array<i64: 16, 32>}]} {
    %c0 = arith.constant 0 : index
    %c0_0 = arith.constant 0 : index
    %0 = vector.load %arg1[%c0, %c0_0] : memref<16x1024xf32, #tpu.memory_space<vmem>>, vector<16x1024xf32>
    %1 = arith.truncf %0 : vector<16x1024xf32> to vector<16x1024xbf16>
    %c0_1 = arith.constant 0 : index
    %c0_2 = arith.constant 0 : index
    %2 = vector.load %arg5[%c0_1, %c0_2] : memref<3x128xf32, #tpu.memory_space<vmem>>, vector<3x128xf32>
    %c0_3 = arith.constant 0 : index
    %c0_4 = arith.constant 0 : index
    %3 = vector.load %arg2[%c0_3, %c0_4] : memref<1024x64xbf16, #tpu.memory_space<vmem>>, vector<1024x64xbf16>
    %cst = arith.constant dense<0.000000e+00> : vector<16x64xf32>
    %4 = tpu.matmul %1, %3, %cst {dimension_numbers = #tpu.dot_dimension_numbers<[1], [0], [0], [1], [0, 0, 1, 1], [], []>} : vector<16x1024xbf16>, vector<1024x64xbf16>, vector<16x64xf32> -> vector<16x64xf32>
    %5 = vector.extract_strided_slice %2 {offsets = [0, 0], sizes = [1, 64], strides = [1, 1]} : vector<3x128xf32> to vector<1x64xf32>
    %6 = vector.broadcast %5 : vector<1x64xf32> to vector<16x64xf32>
    %7 = arith.addf %4, %6 : vector<16x64xf32>
    %cst_5 = arith.constant 0.000000e+00 : f32
    %8 = vector.broadcast %cst_5 : f32 to vector<16x64xf32>
    %9 = arith.maximumf %7, %8 : vector<16x64xf32>
    %10 = arith.truncf %9 : vector<16x64xf32> to vector<16x64xbf16>
    %c0_6 = arith.constant 0 : index
    %c0_7 = arith.constant 0 : index
    %11 = vector.load %arg3[%c0_6, %c0_7] : memref<64x32xbf16, #tpu.memory_space<vmem>>, vector<64x32xbf16>
    %cst_8 = arith.constant dense<0.000000e+00> : vector<16x32xf32>
    %12 = tpu.matmul %10, %11, %cst_8 {dimension_numbers = #tpu.dot_dimension_numbers<[1], [0], [0], [1], [0, 0, 1, 1], [], []>} : vector<16x64xbf16>, vector<64x32xbf16>, vector<16x32xf32> -> vector<16x32xf32>
    %13 = vector.extract_strided_slice %2 {offsets = [1, 0], sizes = [1, 32], strides = [1, 1]} : vector<3x128xf32> to vector<1x32xf32>
    %14 = vector.broadcast %13 : vector<1x32xf32> to vector<16x32xf32>
    %15 = arith.addf %12, %14 : vector<16x32xf32>
    %cst_9 = arith.constant 0.000000e+00 : f32
    %16 = vector.broadcast %cst_9 : f32 to vector<16x32xf32>
    %17 = arith.maximumf %15, %16 : vector<16x32xf32>
    %18 = arith.truncf %17 : vector<16x32xf32> to vector<16x32xbf16>
    %c0_10 = arith.constant 0 : index
    %c0_11 = arith.constant 0 : index
    %19 = vector.load %arg4[%c0_10, %c0_11] : memref<32x32xbf16, #tpu.memory_space<vmem>>, vector<32x32xbf16>
    %cst_12 = arith.constant dense<0.000000e+00> : vector<16x32xf32>
    %20 = tpu.matmul %18, %19, %cst_12 {dimension_numbers = #tpu.dot_dimension_numbers<[1], [0], [0], [1], [0, 0, 1, 1], [], []>} : vector<16x32xbf16>, vector<32x32xbf16>, vector<16x32xf32> -> vector<16x32xf32>
    %21 = vector.extract_strided_slice %2 {offsets = [2, 0], sizes = [1, 32], strides = [1, 1]} : vector<3x128xf32> to vector<1x32xf32>
    %22 = vector.broadcast %21 : vector<1x32xf32> to vector<16x32xf32>
    %23 = arith.addf %20, %22 : vector<16x32xf32>
    %c0_13 = arith.constant 0 : index
    %c0_14 = arith.constant 0 : index
    %24 = vector.load %arg6[%c0_13, %c0_14] : memref<16x32xf32, #tpu.memory_space<vmem>>, vector<16x32xf32>
    tpu.vector_store %arg6[%c0_13, %c0_14], %23 {strides = array<i32>} : memref<16x32xf32, #tpu.memory_space<vmem>>, vector<16x32xf32>,
    return
  }
  func.func @transform_0(%arg0: i32) -> (i32, i32) {
    %c0_i32 = arith.constant 0 : i32
    %c0_i32_0 = arith.constant 0 : i32
    return %arg0, %c0_i32 : i32, i32
  }
  func.func @transform_1(%arg0: i32) -> (i32, i32) {
    %c0_i32 = arith.constant 0 : i32
    %c0_i32_0 = arith.constant 0 : i32
    %c0_i32_1 = arith.constant 0 : i32
    return %c0_i32, %c0_i32_0 : i32, i32
  }
  func.func @transform_2(%arg0: i32) -> (i32, i32) {
    %c0_i32 = arith.constant 0 : i32
    %c0_i32_0 = arith.constant 0 : i32
    %c0_i32_1 = arith.constant 0 : i32
    return %c0_i32, %c0_i32_0 : i32, i32
  }
  func.func @transform_3(%arg0: i32) -> (i32, i32) {
    %c0_i32 = arith.constant 0 : i32
    %c0_i32_0 = arith.constant 0 : i32
    %c0_i32_1 = arith.constant 0 : i32
    return %c0_i32, %c0_i32_0 : i32, i32
  }
  func.func @transform_4(%arg0: i32) -> (i32, i32) {
    %c0_i32 = arith.constant 0 : i32
    %c0_i32_0 = arith.constant 0 : i32
    %c0_i32_1 = arith.constant 0 : i32
    return %c0_i32, %c0_i32_0 : i32, i32
  }
  func.func @transform_5(%arg0: i32) -> (i32, i32) {
    %c0_i32 = arith.constant 0 : i32
    %c0_i32_0 = arith.constant 0 : i32
    return %arg0, %c0_i32 : i32, i32
  }
}

</mosaic_0001>

<bundles_post_ra>
// kernel: _lambda_.1
= control target key start
LH: loop header
LB: loop body
LE: loop exit
PB: predicated region body
PF: predicated region fallthrough
CT: control target
= control target key end

     0   :  { %vm1145_vm0 = vmmov 0   ;;  %vm765_vm1 = vcmask 523264   ;;  %vm833_vm2 = vcmask 261120   ;;  %s1448_s1 = inlined_call_operand.vmem [shape: bf16[1024,64], index: 1, kind: input, shape index: {}]   ;;  %s1449_s0 = inlined_call_operand.vmem [shape: f32[16,1024], index: 0, kind: input, shape index: {}]   ;;  %s1450_s2 = inlined_call_operand.vmem [shape: bf16[64,32], index: 2, kind: input, shape index: {}]   ;;  %s1451_s4 = inlined_call_operand.vmem [shape: f32[3,128], index: 4, kind: input, shape index: {}]   ;;  %s1452_s3 = inlined_call_operand.vmem [shape: bf16[32,32], index: 3, kind: input, shape index: {}]   ;;  %s1453_s5 = inlined_call_operand.vmem [shape: f32[16,32], index: 5, kind: output, shape index: {}]  }
   0x1   :  { %v1074_v0 = vld [vmem:[%s1448_s1 + $0x40] sm:$0xff]   ;;  %v1078_v4 = vld [vmem:[%s1448_s1 + $0x48] sm:$0xff]   ;;  %v1082_v8 = vld [vmem:[%s1448_s1 + $0x50] sm:$0xff]  }
   0x2   :  { %v1075_v1 = vld [vmem:[%s1448_s1 + $0xc0] sm:$0xff]   ;;  %956 = vmatprep.subr.bf16.mxu0 %v1074_v0  ;;  %v1079_v5 = vld [vmem:[%s1448_s1 + $0xc8] sm:$0xff]   ;;  %v1083_v9 = vld [vmem:[%s1448_s1 + $0xd0] sm:$0xff]  }
   0x3   :  { %v1076_v2 = vld [vmem:[%s1448_s1] sm:$0xff]   ;;  %978 = vmatprep.subr.bf16.mxu1 %v1075_v1  ;;  %v1080_v6 = vld [vmem:[%s1448_s1 + $0x8] sm:$0xff]   ;;  %v1084_v10 = vld [vmem:[%s1448_s1 + $0x10] sm:$0xff]  }
   0x4   :  { %v1077_v3 = vld [vmem:[%s1448_s1 + $0x80] sm:$0xff]   ;;  %957 = vmatpush3.bf16.msra.mxu0 %v1076_v2  ;;  %v1081_v7 = vld [vmem:[%s1448_s1 + $0x88] sm:$0xff]   ;;  %v1085_v11 = vld [vmem:[%s1448_s1 + $0x90] sm:$0xff]  }
   0x5   :  { %979 = vmatpush3.bf16.msra.mxu1 %v1077_v3  ;;  %958 = vmatprep.subr.bf16.mxu0 %v1078_v4  ;;  %v1086_v12 = vld [vmem:[%s1448_s1 + $0x58] sm:$0xff]   ;;  %v1090_v16 = vld [vmem:[%s1448_s1 + $0x60] sm:$0xff]   ;;  %v1094_v20 = vld [vmem:[%s1448_s1 + $0x68] sm:$0xff]  }
   0x6   :  { %980 = vmatprep.subr.bf16.mxu1 %v1079_v5  ;;  %v1087_v13 = vld [vmem:[%s1448_s1 + $0xd8] sm:$0xff]   ;;  %v1091_v17 = vld [vmem:[%s1448_s1 + $0xe0] sm:$0xff]   ;;  %v1095_v21 = vld [vmem:[%s1448_s1 + $0xe8] sm:$0xff]  }
   0x7   :  { %v1088_v14 = vld [vmem:[%s1448_s1 + $0x18] sm:$0xff]   ;;  %v1092_v18 = vld [vmem:[%s1448_s1 + $0x20] sm:$0xff]   ;;  %v1096_v22 = vld [vmem:[%s1448_s1 + $0x28] sm:$0xff]  }
   0x8   :  { %959 = vmatpush3.bf16.msra.mxu0 %v1080_v6  ;;  %v1089_v15 = vld [vmem:[%s1448_s1 + $0x98] sm:$0xff]   ;;  %v1093_v19 = vld [vmem:[%s1448_s1 + $0xa0] sm:$0xff]   ;;  %v1097_v23 = vld [vmem:[%s1448_s1 + $0xa8] sm:$0xff]  }
   0x9   :  { %981 = vmatpush3.bf16.msra.mxu1 %v1081_v7  ;;  %960 = vmatprep.subr.bf16.mxu0 %v1082_v8  ;;  %v1098_v24 = vld [vmem:[%s1448_s1 + $0x70] sm:$0xff]   ;;  %v1102_v28 = vld [vmem:[%s1448_s1 + $0x78] sm:$0xff]   ;;  %v22_v32 = vld [vmem:[%s1449_s0 + $0x8] sm:$0xff] }
   0xa   :  { %982 = vmatprep.subr.bf16.mxu1 %v1083_v9  ;;  %v1099_v25 = vld [vmem:[%s1448_s1 + $0xf0] sm:$0xff]   ;;  %v1103_v29 = vld [vmem:[%s1448_s1 + $0xf8] sm:$0xff]   ;;  %v30_v33 = vld [vmem:[%s1449_s0 + $0x48] sm:$0xff] }
   0xb   :  { %v1100_v26 = vld [vmem:[%s1448_s1 + $0x30] sm:$0xff]   ;;  %v1104_v30 = vld [vmem:[%s1448_s1 + $0x38] sm:$0xff]   ;;  %v38_v35 = vpack.c.bf16 %v30_v33, %v22_v32  ;;  %v21_v37 = vld [vmem:[%s1449_s0] sm:$0xff] }
   0xc   :  { %961 = vmatpush3.bf16.msra.mxu0 %v1084_v10  ;;  %v1101_v27 = vld [vmem:[%s1448_s1 + $0xb0] sm:$0xff]   ;;  %v1105_v31 = vld [vmem:[%s1448_s1 + $0xb8] sm:$0xff]   ;;  %v29_v38 = vld [vmem:[%s1449_s0 + $0x40] sm:$0xff] }
   0xd   :  { %983 = vmatpush3.bf16.msra.mxu1 %v1085_v11  ;;  %962 = vmatprep.subr.bf16.mxu0 %v1086_v12  ;;  %v24_v34 = vld [vmem:[%s1449_s0 + $0x18] sm:$0xff]  ;;  %v37_v40 = vpack.c.bf16 %v29_v38, %v21_v37  ;;  %v23_v41 = vld [vmem:[%s1449_s0 + $0x10] sm:$0xff]  ;;  %v1106_v44 = vld [vmem:[%s1448_s1 + $0x140] sm:$0xff]  }
   0xe   :  { %984 = vmatprep.subr.bf16.mxu1 %v1087_v13  ;;  %v32_v36 = vld [vmem:[%s1449_s0 + $0x58] sm:$0xff]  ;;  %v31_v42 = vld [vmem:[%s1449_s0 + $0x50] sm:$0xff]  ;;  %594 = vmatprep.mubr.bf16.mxu0 %v38_v35  ;;  %v1107_v45 = vld [vmem:[%s1448_s1 + $0x1c0] sm:$0xff]  }
   0xf   :  { %v40_v39 = vpack.c.bf16 %v32_v36, %v24_v34  ;;  %v39_v43 = vpack.c.bf16 %v31_v42, %v23_v41  ;;  %v1108_v46 = vld [vmem:[%s1448_s1 + $0x100] sm:$0xff]   ;;  %v1110_v48 = vld [vmem:[%s1448_s1 + $0x148] sm:$0xff]   ;;  %v1114_v52 = vld [vmem:[%s1448_s1 + $0x150] sm:$0xff]  }
  0x10   :  { %963 = vmatpush3.bf16.msra.mxu0 %v1088_v14  ;;  %v1109_v47 = vld [vmem:[%s1448_s1 + $0x180] sm:$0xff]   ;;  %v1111_v49 = vld [vmem:[%s1448_s1 + $0x1c8] sm:$0xff]   ;;  %v1115_v53 = vld [vmem:[%s1448_s1 + $0x1d0] sm:$0xff]  }
  0x11   :  { %985 = vmatpush3.bf16.msra.mxu1 %v1089_v15  ;;  %964 = vmatprep.subr.bf16.mxu0 %v1090_v16  ;;  %v1112_v50 = vld [vmem:[%s1448_s1 + $0x108] sm:$0xff]   ;;  %v1116_v54 = vld [vmem:[%s1448_s1 + $0x110] sm:$0xff]   ;;  %v1118_v56 = vld [vmem:[%s1448_s1 + $0x158] sm:$0xff]  }
  0x12   :  { %986 = vmatprep.subr.bf16.mxu1 %v1091_v17  ;;  %635 = vmatprep.mubr.bf16.mxu1 %v40_v39  ;;  %v1113_v51 = vld [vmem:[%s1448_s1 + $0x188] sm:$0xff]   ;;  %v1117_v55 = vld [vmem:[%s1448_s1 + $0x190] sm:$0xff]   ;;  %v1119_v57 = vld [vmem:[%s1448_s1 + $0x1d8] sm:$0xff]  }
  0x13   :  { %v1120_v58 = vld [vmem:[%s1448_s1 + $0x118] sm:$0xff]   ;;  %v1122_v60 = vld [vmem:[%s1448_s1 + $0x160] sm:$0xff]   ;;  %v1126_v0 = vld [vmem:[%s1448_s1 + $0x168] sm:$0xff]  }
  0x14   :  { %965 = vmatpush3.bf16.msra.mxu0 %v1092_v18  ;;  %v1121_v59 = vld [vmem:[%s1448_s1 + $0x198] sm:$0xff]   ;;  %v1123_v61 = vld [vmem:[%s1448_s1 + $0x1e0] sm:$0xff]   ;;  %v1127_v1 = vld [vmem:[%s1448_s1 + $0x1e8] sm:$0xff]  }
  0x15   :  { %987 = vmatpush3.bf16.msra.mxu1 %v1093_v19  ;;  %966 = vmatprep.subr.bf16.mxu0 %v1094_v20  ;;  %v1124_v62 = vld [vmem:[%s1448_s1 + $0x120] sm:$0xff]   ;;  %v1128_v2 = vld [vmem:[%s1448_s1 + $0x128] sm:$0xff]   ;;  %v1130_v4 = vld [vmem:[%s1448_s1 + $0x170] sm:$0xff]  }
  0x16   :  { %988 = vmatprep.subr.bf16.mxu1 %v1095_v21  ;;  %v1125_v63 = vld [vmem:[%s1448_s1 + $0x1a0] sm:$0xff]   ;;  %v1129_v3 = vld [vmem:[%s1448_s1 + $0x1a8] sm:$0xff]   ;;  %v1131_v5 = vld [vmem:[%s1448_s1 + $0x1f0] sm:$0xff]  }
  0x17   :  { %v1132_v6 = vld [vmem:[%s1448_s1 + $0x130] sm:$0xff]   ;;  %v1134_v8 = vld [vmem:[%s1448_s1 + $0x178] sm:$0xff]   ;;  %v26_v12 = vld [vmem:[%s1449_s0 + $0x28] sm:$0xff] }
  0x18   :  { %967 = vmatpush3.bf16.msra.mxu0 %v1096_v22  ;;  %v1133_v7 = vld [vmem:[%s1448_s1 + $0x1b0] sm:$0xff]   ;;  %v1135_v9 = vld [vmem:[%s1448_s1 + $0x1f8] sm:$0xff]   ;;  %v34_v13 = vld [vmem:[%s1449_s0 + $0x68] sm:$0xff] }
  0x19   :  { %989 = vmatpush3.bf16.msra.mxu1 %v1097_v23  ;;  %968 = vmatprep.subr.bf16.mxu0 %v1098_v24  ;;  %v1136_v10 = vld [vmem:[%s1448_s1 + $0x138] sm:$0xff]   ;;  %v42_v16 = vpack.c.bf16 %v34_v13, %v26_v12  ;;  %v25_v18 = vld [vmem:[%s1449_s0 + $0x20] sm:$0xff]  ;;  %v27_v20 = vld [vmem:[%s1449_s0 + $0x30] sm:$0xff]  ;;  %v1144_v24 = vmov 0.0  }
  0x1a   :  { %990 = vmatprep.subr.bf16.mxu1 %v1099_v25  ;;  %v1137_v11 = vld [vmem:[%s1448_s1 + $0x1b8] sm:$0xff]   ;;  %v33_v19 = vld [vmem:[%s1449_s0 + $0x60] sm:$0xff]  ;;  %v35_v22 = vld [vmem:[%s1449_s0 + $0x70] sm:$0xff] }
  0x1b   :  { %v28_v14 = vld [vmem:[%s1449_s0 + $0x38] sm:$0xff]  ;;  %v41_v21 = vpack.c.bf16 %v33_v19, %v25_v18  ;;  %v43_v23 = vpack.c.bf16 %v35_v22, %v27_v20  ;;  %v1138_v25 = vld [vmem:[%s1450_s2] sm:$0xff]  }
  0x1c   :  { %969 = vmatpush3.bf16.msra.mxu0 %v1100_v26  ;;  %v36_v15 = vld [vmem:[%s1449_s0 + $0x78] sm:$0xff]  ;;  %v1139_v26 = vld [vmem:[%s1450_s2 + $0x8] sm:$0xff]   ;;  %v45_v32 = vld [vmem:[%s1451_s4] sm:$0x7] }
  0x1d   :  { %991 = vmatpush3.bf16.msra.mxu1 %v1101_v27  ;;  %970 = vmatprep.subr.bf16.mxu0 %v1102_v28  ;;  %v44_v17 = vpack.c.bf16 %v36_v15, %v28_v14  ;;  %v1140_v27 = vld [vmem:[%s1450_s2 + $0x10] sm:$0xff]   ;;  %v1141_v28 = vld [vmem:[%s1450_s2 + $0x18] sm:$0xff]  }
  0x1e   :  { %992 = vmatprep.subr.bf16.mxu1 %v1103_v29  ;;  %v174_v29 = vlaneseq }
  0x20   :  { %971 = vmatpush3.bf16.msra.mxu0 %v1104_v30  ;;  %v1428_v30 = vshrl.u32 %v174_v29, 7 }
  0x21   :  { %993 = vmatpush3.bf16.msra.mxu1 %v1105_v31  ;;  %1000 = vmatprep.subr.bf16.mxu0 %v1106_v44 }
  0x22   :  { %1022 = vmatprep.subr.bf16.mxu1 %v1107_v45  ;;  %v176_v31 = vsub.s32 0, %v1428_v30  ;;  %v819_v18 = vsub.s32 2, %v1428_v30 }
  0x23   :  { %595 = vmatmul.mubr.bf16.vlgmr.msra.gmra.mrb[0].mxu0 %v37_v40 }
  0x24   :  { %636 = vmatmul.mubr.bf16.vlgmr.msra.gmra.mrb[0].mxu1 %v39_v43  ;;  %1001 = vmatpush3.bf16.msra.mxu0 %v1108_v46  ;;  %v177_v34 = vrot.slane %v45_v32, %v176_v31  ;;  %v820_v19 = vrot.slane %v45_v32, %v819_v18 }
  0x25   :  { %1023 = vmatpush3.bf16.msra.mxu1 %v1109_v47  ;;  %1002 = vmatprep.subr.bf16.mxu0 %v1110_v48 }
  0x26   :  { %1024 = vmatprep.subr.bf16.mxu1 %v1111_v49  ;;  %676 = vmatprep.mubr.bf16.mxu0 %v42_v16 }
  0x27   :  { %717 = vmatprep.mubr.bf16.mxu1 %v44_v17 }
  0x28   :  { %1003 = vmatpush3.bf16.msra.mxu0 %v1112_v50 }
  0x29   :  { %1025 = vmatpush3.bf16.msra.mxu1 %v1113_v51  ;;  %1004 = vmatprep.subr.bf16.mxu0 %v1114_v52 }
  0x2a   :  { %1026 = vmatprep.subr.bf16.mxu1 %v1115_v53 }
  0x2c   :  { %1005 = vmatpush3.bf16.msra.mxu0 %v1116_v54 }
  0x2d   :  { %1027 = vmatpush3.bf16.msra.mxu1 %v1117_v55  ;;  %1006 = vmatprep.subr.bf16.mxu0 %v1118_v56 }
  0x2e   :  { %1028 = vmatprep.subr.bf16.mxu1 %v1119_v57 }
  0x30   :  { %1007 = vmatpush3.bf16.msra.mxu0 %v1120_v58 }
  0x31   :  { %1029 = vmatpush3.bf16.msra.mxu1 %v1121_v59  ;;  %1008 = vmatprep.subr.bf16.mxu0 %v1122_v60 }
  0x32   :  { %1030 = vmatprep.subr.bf16.mxu1 %v1123_v61 }
  0x34   :  { %1009 = vmatpush3.bf16.msra.mxu0 %v1124_v62 }
  0x35   :  { %1031 = vmatpush3.bf16.msra.mxu1 %v1125_v63  ;;  %1010 = vmatprep.subr.bf16.mxu0 %v1126_v0 }
  0x36   :  { %1032 = vmatprep.subr.bf16.mxu1 %v1127_v1 }
  0x38   :  { %1011 = vmatpush3.bf16.msra.mxu0 %v1128_v2 }
  0x39   :  { %1033 = vmatpush3.bf16.msra.mxu1 %v1129_v3  ;;  %1012 = vmatprep.subr.bf16.mxu0 %v1130_v4 }
  0x3a   :  { %1034 = vmatprep.subr.bf16.mxu1 %v1131_v5  ;;  %v1142_v5 = vld [vmem:[%s1452_s3] sm:$0xff]  }
  0x3c   :  { %1013 = vmatpush3.bf16.msra.mxu0 %v1132_v6  ;;  %v1143_v6 = vld [vmem:[%s1452_s3 + $0x8] sm:$0xff]  }
  0x3d   :  { %1035 = vmatpush3.bf16.msra.mxu1 %v1133_v7  ;;  %1014 = vmatprep.subr.bf16.mxu0 %v1134_v8  ;;  %v739_v7 = vsub.s32 1, %v1428_v30 }
  0x3e   :  { %1036 = vmatprep.subr.bf16.mxu1 %v1135_v9 }
  0x3f   :  { %v740_v8 = vrot.slane %v45_v32, %v739_v7 }
  0x40   :  { %1015 = vmatpush3.bf16.msra.mxu0 %v1136_v10 }
  0x41   :  { %1037 = vmatpush3.bf16.msra.mxu1 %v1137_v11  ;;  %1052 = vmatprep.subr.bf16.mxu0 %v1144_v24 }
  0x42   :  { %1064 = vmatprep.subr.bf16.mxu1 %v1144_v24 }
  0x43   :  { %677 = vmatmul.mubr.bf16.vlgmr.msra.gmra.mrb[4].mxu0 %v41_v21 }
  0x44   :  { %718 = vmatmul.mubr.bf16.vlgmr.msra.gmra.mrb[4].mxu1 %v43_v23  ;;  %1053 = vmatpush3.bf16.msra.mxu0 %v1138_v25 }
  0x45   :  { %1054 = vmatprep.subr.bf16.mxu0 %v1144_v24  ;;  %1060 = vmatprep.mubr.msk.bf16.mxu0 %vm1145_vm0, %v1144_v24 }
  0x46   :  { %1068 = vmatprep.mubr.msk.bf16.mxu1 %vm1145_vm0, %v1144_v24  ;;  %1065 = vmatpush3.bf16.msra.mxu1 %v1142_v5 }
  0x47   :  { %1066 = vmatprep.subr.bf16.mxu1 %v1144_v24 }
  0x48   :  { %1055 = vmatpush3.bf16.msra.mxu0 %v1139_v26 }
  0x49   :  { %1056 = vmatprep.subr.bf16.mxu0 %v1144_v24 }
  0x4a   :  { %1067 = vmatpush3.bf16.msra.mxu1 %v1143_v6 }
  0x4c   :  { %1057 = vmatpush3.bf16.msra.mxu0 %v1140_v27 }
  0x4d   :  { %1058 = vmatprep.subr.bf16.mxu0 %v1144_v24 }
  0x50   :  { %1059 = vmatpush3.bf16.msra.mxu0 %v1141_v28 }
  0xf6   :  { %v972_v33 = vpop.f32.mrb[0].mxu0 }
  0xf7   :  { %v994_v35 = vpop.f32.mrb[0].mxu1  ;;  %v973_v36 = vpop.f32.mrb[1].mxu0 }
  0xf8   :  { %v974_v37 = vadd.f32 %v973_v36, %v972_v33  ;;  %v995_v38 = vpop.f32.mrb[1].mxu1  ;;  %v975_v39 = vpop.f32.mrb[2].mxu0 }
  0xf9   :  { %v996_v40 = vadd.f32 %v995_v38, %v994_v35  ;;  %v997_v41 = vpop.f32.mrb[2].mxu1  ;;  %v976_v42 = vpop.f32.mrb[3].mxu0 }
  0xfa   :  { %v597_v43 = vadd.f32 %v974_v37, %v177_v34  ;;  %v977_v44 = vadd.f32 %v976_v42, %v975_v39  ;;  %v998_v45 = vpop.f32.mrb[3].mxu1 }
  0xfb   :  { %v999_v46 = vadd.f32 %v998_v45, %v997_v41 }
  0xfc   :  { %v638_v47 = vadd.f32 %v996_v40, %v597_v43  ;;  %v600_v48 = vadd.f32 %v977_v44, %v177_v34 }
  0xfe   :  { %v641_v49 = vadd.f32 %v999_v46, %v600_v48 }
 0x116   :  { %v1016_v50 = vpop.f32.mrb[4].mxu0 }
 0x117   :  { %v1038_v51 = vpop.f32.mrb[4].mxu1  ;;  %v1017_v52 = vpop.f32.mrb[5].mxu0 }
 0x118   :  { %v1018_v53 = vadd.f32 %v1017_v52, %v1016_v50  ;;  %v1039_v54 = vpop.f32.mrb[5].mxu1  ;;  %v1019_v55 = vpop.f32.mrb[6].mxu0 }
 0x119   :  { %v1040_v56 = vadd.f32 %v1039_v54, %v1038_v51  ;;  %v1041_v57 = vpop.f32.mrb[6].mxu1  ;;  %v1020_v58 = vpop.f32.mrb[7].mxu0 }
 0x11a   :  { %v679_v59 = vadd.f32 %v1018_v53, %v638_v47  ;;  %v1021_v60 = vadd.f32 %v1020_v58, %v1019_v55  ;;  %v1042_v61 = vpop.f32.mrb[7].mxu1 }
 0x11b   :  { %v1043_v62 = vadd.f32 %v1042_v61, %v1041_v57 }
 0x11c   :  { %v720_v63 = vadd.f32 %v1040_v56, %v679_v59  ;;  %v682_v0 = vadd.f32 %v1021_v60, %v641_v49 }
 0x11e   :  { %v723_v1 = vadd.f32 %v1043_v62, %v682_v0  ;;  %v726_v2 = vmax.f32 %v720_v63, 0.0 }
 0x120   :  { %v727_v3 = vmax.f32 %v723_v1, 0.0 }
 0x122   :  { %v728_v4 = vpack.c.bf16 %v727_v3, %v726_v2 }
 0x124   :  { %1061 = vmatmul.mubr.msk.bf16.vlgmr.msra.gmra.mrb[8].mxu0 %vm765_vm1, %v728_v4 }
 0x1f7   :  { %v803_v9 = vpop.f32.mrb[8].mxu0 }
 0x1f8   :  { %v804_v10 = vadd.f32 %v803_v9, %v740_v8  ;;  %v1062_v11 = vpop.f32.mrb[9].mxu0 }
 0x1f9   :  { %v806_v12 = vpop.f32.mrb[10].mxu0 }
 0x1fa   :  { %v807_v13 = vadd.f32 %v806_v12, %v740_v8  ;;  %v1063_v14 = vpop.f32.mrb[11].mxu0  ;;  %v810_v15 = vmax.f32 %v804_v10, 0.0 }
 0x1fc   :  { %v811_v16 = vmax.f32 %v807_v13, 0.0 }
 0x1fe   :  { %v812_v17 = vpack.c.bf16 %v811_v16, %v810_v15 }
 0x200   :  { %1069 = vmatmul.mubr.msk.bf16.vlgmr.msra.gmra.mrb[8].mxu1 %vm833_vm2, %v812_v17 }
 0x2d3   :  { %v871_v20 = vpop.f32.mrb[8].mxu1 }
 0x2d4   :  { %v872_v21 = vadd.f32 %v871_v20, %v820_v19  ;;  %v1070_v22 = vpop.f32.mrb[9].mxu1 }
 0x2d5   :  { %v874_v23 = vpop.f32.mrb[10].mxu1 }
 0x2d6   :  { %878 = vst.msk [vmem:[%s1453_s5] sm:$0xff] %vm833_vm2, %v872_v21  ;;  %v875_v24 = vadd.f32 %v874_v23, %v820_v19  ;;  %v1071_v25 = vpop.f32.mrb[11].mxu1 }
 0x2d8   :  { %879 = vst.msk [vmem:[%s1453_s5 + $0x8] sm:$0xff] %vm833_vm2, %v875_v24 }

</bundles_post_ra>
